<compile_context>
chip_gen: v5e
topology: v5e:2x2
jax: 0.10.0
libtpu: 0.0.40
codegen_flags: <defaults>
</compile_context>

<pallas_src>
import jax
import jax.numpy as jnp
from jax import lax
from jax.experimental import pallas as pl
from jax.experimental.pallas import tpu as pltpu

EPS = 1e-5
LANES = 128


def _make_kernel(N, H, W, Cin, Cout):
    NH = N * H
    K1 = W * Cin            # LHS lane width per dy tap (no K zero-padding)
    K2 = W * Cout           # output lane width (128 at these shapes)
    M = N * H * W           # elements per channel for both BatchNorms
    inv_M = 1.0 / M

    def fold_matrix(K, C):
        # F[i, j] = 1/M if i ≡ j (mod C) else 0.  Right-multiplying a (rows,K)
        # stat slab by F sums every lane sharing a channel and leaves the
        # result replicated in the per-(w, c) lane layout, already scaled to a
        # mean.  One tiny MXU matmul instead of a chain of lane rolls.
        ii = lax.broadcasted_iota(jnp.int32, (K, K), 0)
        jj = lax.broadcasted_iota(jnp.int32, (K, K), 1)
        return jnp.where((ii % C) == (jj % C), inv_M, 0.0)

    def kernel(x_ref, wb_ref, p_ref, o_ref):
        x = x_ref[...]                                          # (NH, K1) f32

        # ---- BN1 (training mode), single-pass stats; channel = lane % Cin --
        stats1 = jnp.concatenate(
            [jnp.sum(x, axis=0, keepdims=True),
             jnp.sum(x * x, axis=0, keepdims=True)], axis=0)     # (2, K1)
        f1 = jnp.dot(stats1, fold_matrix(K1, Cin),
                     preferred_element_type=jnp.float32)         # mean, E[x^2]
        m1 = f1[0:1, :]
        v1 = f1[1:2, :] - m1 * m1
        sc1 = p_ref[0:1, 0:K1] * lax.rsqrt(v1 + EPS)
        sh1 = p_ref[1:2, 0:K1] - m1 * sc1
        xn = jnp.maximum(x * sc1 + sh1, 0.0)                     # (NH, K1)

        # ---- height halo in-register: static sublane rolls + boundary mask -
        h = lax.broadcasted_iota(jnp.int32, (NH, 1), 0) % H
        up = jnp.where(h == 0,     0.0, pltpu.roll(xn, 1,      axis=0))  # row-1
        dn = jnp.where(h == H - 1, 0.0, pltpu.roll(xn, NH - 1, axis=0))  # row+1

        # ---- 3x3 conv as ONE lane-dense MXU matmul --------------------------
        # dx taps folded into banded weights (wrapper); dy taps stacked on K.
        lhs = jnp.concatenate([up, xn, dn], axis=1)              # (NH, 3*K1)
        y = jnp.dot(lhs, wb_ref[...],
                    preferred_element_type=jnp.float32)          # (NH, K2)
        # Conv bias intentionally omitted: a per-channel constant cancels
        # exactly inside the following training-mode BatchNorm (y - mean(y)).

        # ---- BN2 (training mode) + ReLU; channel = lane % Cout --------------
        stats2 = jnp.concatenate(
            [jnp.sum(y, axis=0, keepdims=True),
             jnp.sum(y * y, axis=0, keepdims=True)], axis=0)     # (2, K2)
        f2 = jnp.dot(stats2, fold_matrix(K2, Cout),
                     preferred_element_type=jnp.float32)
        m2 = f2[0:1, :]
        v2 = f2[1:2, :] - m2 * m2
        sc2 = p_ref[2:3, 0:K2] * lax.rsqrt(v2 + EPS)
        sh2 = p_ref[3:4, 0:K2] - m2 * sc2
        # Fully lane-dense (NH, W*Cout) store.
        o_ref[...] = jnp.maximum(y * sc2 + sh2, 0.0).astype(o_ref.dtype)

    return kernel


def bn_conv_bn(x_nchw, w_oihw, bias, g1, b1, g2, b2):
    """Fused BN -> ReLU -> Conv3x3(s=1,p=1) -> BN -> ReLU. NCHW in/out."""
    del bias  # cancels exactly inside the following training-mode BatchNorm
    N, Cin, H, W = x_nchw.shape
    Cout, _, KH, KW = w_oihw.shape
    K1, K2 = W * Cin, W * Cout

    # Lane-dense specialization: (W*C) must fit on the 128-lane axis.
    assert K1 <= LANES and K2 <= LANES, (W, Cin, Cout)
    # TODO(synk): at realistic sizes add an H-strip grid (parallel dims so
    # v7x's second TensorCore is used) with a two-pass BN; unnecessary here.

    # Wrapper-side layout plumbing (pure XLA): NCHW -> (N*H, W*Cin), no K pad.
    # TODO(synk): keep activations lane-dense NHWC across adjacent fused
    # blocks instead of converting NCHW<->dense around every call.
    x_dense = jnp.transpose(x_nchw, (0, 2, 3, 1)).reshape(N * H, K1)

    # Banded weights, built vectorized (no per-tap dynamic-update-slices):
    #   wb[dy*K1 + src*Cin + ci, w*Cout + co] = weight[co, ci, dy, dx]
    # with src = w + dx - 1 when in range, zero otherwise, so that
    #   y = [up | xn | dn] @ wb   reproduces the zero-padded 3x3 conv.
    wt = jnp.transpose(w_oihw, (2, 3, 1, 0)).astype(jnp.float32)   # (KH,KW,Ci,Co)
    bands = jnp.stack([jnp.eye(W, k=1 - dx, dtype=jnp.float32)
                       for dx in range(KW)])                       # (KW, src, w)
    wb = jnp.einsum('xsw,yxio->ysiwo', bands, wt).reshape(KH * K1, K2)

    # Pack all four BN affine vectors into one small slab (single DMA).
    pw = max(K1, K2)
    p12 = jnp.stack([jnp.tile(g1, W), jnp.tile(b1, W)]).astype(jnp.float32)
    p34 = jnp.stack([jnp.tile(g2, W), jnp.tile(b2, W)]).astype(jnp.float32)
    params = jnp.concatenate(
        [jnp.pad(p12, ((0, 0), (0, pw - K1))),
         jnp.pad(p34, ((0, 0), (0, pw - K2)))], axis=0)            # (4, pw)

    vmem = pl.BlockSpec(memory_space=pltpu.MemorySpace.VMEM)
    out_dense = pl.pallas_call(
        _make_kernel(N, H, W, Cin, Cout),
        out_shape=jax.ShapeDtypeStruct((N * H, K2), jnp.float32),
        in_specs=[vmem, vmem, vmem],
        out_specs=vmem,
    )(x_dense, wb, params)

    out = out_dense.reshape(N, H, W, Cout)
    return jnp.transpose(out, (0, 3, 1, 2))                       # -> NCHW


def _reference(x_nchw, w_oihw, bias, g1, b1, g2, b2):
    """Pure-JAX reference matching the PyTorch training-mode forward."""
    m1 = jnp.mean(x_nchw, axis=(0, 2, 3), keepdims=True)
    v1 = jnp.mean((x_nchw - m1) ** 2, axis=(0, 2, 3), keepdims=True)
    xn = (x_nchw - m1) / jnp.sqrt(v1 + EPS)
    xn = xn * g1[None, :, None, None] + b1[None, :, None, None]
    xn = jnp.maximum(xn, 0.0)
    y = lax.conv_general_dilated(
        xn, w_oihw, window_strides=(1, 1), padding=((1, 1), (1, 1)),
        dimension_numbers=("NCHW", "OIHW", "NCHW"))
    y = y + bias[None, :, None, None]
    m2 = jnp.mean(y, axis=(0, 2, 3), keepdims=True)
    v2 = jnp.mean((y - m2) ** 2, axis=(0, 2, 3), keepdims=True)
    yn = (y - m2) / jnp.sqrt(v2 + EPS)
    yn = yn * g2[None, :, None, None] + b2[None, :, None, None]
    return jnp.maximum(yn, 0.0)


if __name__ == "__main__":
    # Small shapes consistent with the module: N=2, Cin=4, Cout=8, H=W=16.
    N, Cin, Cout, H, W = 2, 4, 8, 16, 16
    key = jax.random.PRNGKey(0)
    kx, kw, kb, kg1, kb1, kg2, kb2 = jax.random.split(key, 7)

    x = jax.random.normal(kx, (N, Cin, H, W), dtype=jnp.float32)
    w_oihw = 0.1 * jax.random.normal(kw, (Cout, Cin, 3, 3), dtype=jnp.float32)
    bias = 0.1 * jax.random.normal(kb, (Cout,), dtype=jnp.float32)
    g1 = 1.0 + 0.1 * jax.random.normal(kg1, (Cin,), dtype=jnp.float32)
    b1 = 0.1 * jax.random.normal(kb1, (Cin,), dtype=jnp.float32)
    g2 = 1.0 + 0.1 * jax.random.normal(kg2, (Cout,), dtype=jnp.float32)
    b2 = 0.1 * jax.random.normal(kb2, (Cout,), dtype=jnp.float32)

    out = jax.block_until_ready(
        jax.jit(bn_conv_bn)(x, w_oihw, bias, g1, b1, g2, b2))
    ref = jax.block_until_ready(_reference(x, w_oihw, bias, g1, b1, g2, b2))

    assert out.shape == (N, Cout, H, W), out.shape
    max_err = float(jnp.max(jnp.abs(out - ref)))
    assert jnp.allclose(out, ref, atol=2e-4, rtol=2e-4), max_err

    print("KERNEL_OK")
</pallas_src>

<mosaic_0001>
module attributes {stable_mosaic.version = 11 : i64} {
  func.func @kernel(%arg0: memref<32x64xf32, #tpu.memory_space<vmem>>, %arg1: memref<192x128xf32, #tpu.memory_space<vmem>>, %arg2: memref<4x128xf32, #tpu.memory_space<vmem>>, %arg3: memref<32x128xf32, #tpu.memory_space<vmem>>) attributes {dimension_semantics = [], scalar_prefetch = 0 : i64, scratch_operands = 0 : i64, tpu.core_type = #tpu.core_type<tc>} {
    %c0 = arith.constant 0 : index
    %c0_0 = arith.constant 0 : index
    %0 = vector.load %arg0[%c0, %c0_0] : memref<32x64xf32, #tpu.memory_space<vmem>>, vector<32x64xf32>
    %cst = arith.constant dense<0.000000e+00> : vector<64xf32>
    %1 = vector.multi_reduction <add>, %0, %cst [0] : vector<32x64xf32> to vector<64xf32>
    %2 = vector.shape_cast %1 : vector<64xf32> to vector<1x64xf32>
    %3 = arith.mulf %0, %0 : vector<32x64xf32>
    %cst_1 = arith.constant dense<0.000000e+00> : vector<64xf32>
    %4 = vector.multi_reduction <add>, %3, %cst_1 [0] : vector<32x64xf32> to vector<64xf32>
    %5 = vector.shape_cast %4 : vector<64xf32> to vector<1x64xf32>
    %6 = tpu.concatenate %2, %5 in 0 : vector<1x64xf32>, vector<1x64xf32> -> vector<2x64xf32>
    %7 = tpu.iota {dimensions = array<i32: 0>} : vector<64x64xi32>
    %8 = tpu.iota {dimensions = array<i32: 1>} : vector<64x64xi32>
    %c4_i32 = arith.constant 4 : i32
    %c0_i32 = arith.constant 0 : i32
    %9 = arith.cmpi eq, %c4_i32, %c0_i32 : i32
    %c1_i32 = arith.constant 1 : i32
    %10 = arith.select %9, %c1_i32, %c4_i32 : i32
    %11 = vector.broadcast %10 : i32 to vector<64x64xi32>
    %12 = arith.remsi %7, %11 : vector<64x64xi32>
    %c0_i32_2 = arith.constant 0 : i32
    %13 = vector.broadcast %c0_i32_2 : i32 to vector<64x64xi32>
    %14 = arith.cmpi ne, %12, %13 : vector<64x64xi32>
    %c0_i32_3 = arith.constant 0 : i32
    %15 = vector.broadcast %c0_i32_3 : i32 to vector<64x64xi32>
    %16 = arith.cmpi slt, %12, %15 : vector<64x64xi32>
    %c0_i32_4 = arith.constant 0 : i32
    %17 = arith.cmpi slt, %10, %c0_i32_4 : i32
    %18 = vector.broadcast %17 : i1 to vector<64x64xi1>
    %19 = vector.broadcast %18 : vector<64x64xi1> to vector<64x64xi1>
    %20 = arith.xori %16, %19 : vector<64x64xi1>
    %21 = arith.andi %20, %14 : vector<64x64xi1>
    %22 = vector.broadcast %10 : i32 to vector<64x64xi32>
    %23 = arith.addi %12, %22 : vector<64x64xi32>
    %24 = arith.select %21, %23, %12 : vector<64x64xi1>, vector<64x64xi32>
    %c4_i32_5 = arith.constant 4 : i32
    %c0_i32_6 = arith.constant 0 : i32
    %25 = arith.cmpi eq, %c4_i32_5, %c0_i32_6 : i32
    %c1_i32_7 = arith.constant 1 : i32
    %26 = arith.select %25, %c1_i32_7, %c4_i32_5 : i32
    %27 = vector.broadcast %26 : i32 to vector<64x64xi32>
    %28 = arith.remsi %8, %27 : vector<64x64xi32>
    %c0_i32_8 = arith.constant 0 : i32
    %29 = vector.broadcast %c0_i32_8 : i32 to vector<64x64xi32>
    %30 = arith.cmpi ne, %28, %29 : vector<64x64xi32>
    %c0_i32_9 = arith.constant 0 : i32
    %31 = vector.broadcast %c0_i32_9 : i32 to vector<64x64xi32>
    %32 = arith.cmpi slt, %28, %31 : vector<64x64xi32>
    %c0_i32_10 = arith.constant 0 : i32
    %33 = arith.cmpi slt, %26, %c0_i32_10 : i32
    %34 = vector.broadcast %33 : i1 to vector<64x64xi1>
    %35 = vector.broadcast %34 : vector<64x64xi1> to vector<64x64xi1>
    %36 = arith.xori %32, %35 : vector<64x64xi1>
    %37 = arith.andi %36, %30 : vector<64x64xi1>
    %38 = vector.broadcast %26 : i32 to vector<64x64xi32>
    %39 = arith.addi %28, %38 : vector<64x64xi32>
    %40 = arith.select %37, %39, %28 : vector<64x64xi1>, vector<64x64xi32>
    %41 = arith.cmpi eq, %24, %40 : vector<64x64xi32>
    %cst_11 = arith.constant 0.001953125 : f32
    %cst_12 = arith.constant 0.000000e+00 : f32
    %42 = vector.broadcast %cst_11 : f32 to vector<64x64xf32>
    %43 = vector.broadcast %cst_12 : f32 to vector<64x64xf32>
    %44 = arith.select %41, %42, %43 : vector<64x64xi1>, vector<64x64xf32>
    %cst_13 = arith.constant dense<0.000000e+00> : vector<2x64xf32>
    %45 = tpu.matmul %6, %44, %cst_13 {dimension_numbers = #tpu.dot_dimension_numbers<[1], [0], [0], [1], [0, 0, 1, 1], [], []>} : vector<2x64xf32>, vector<64x64xf32>, vector<2x64xf32> -> vector<2x64xf32>
    %46 = vector.extract_strided_slice %45 {offsets = [0, 0], sizes = [1, 64], strides = [1, 1]} : vector<2x64xf32> to vector<1x64xf32>
    %47 = vector.extract_strided_slice %45 {offsets = [1, 0], sizes = [1, 64], strides = [1, 1]} : vector<2x64xf32> to vector<1x64xf32>
    %48 = arith.mulf %46, %46 : vector<1x64xf32>
    %49 = arith.subf %47, %48 : vector<1x64xf32>
    %c0_14 = arith.constant 0 : index
    %c0_15 = arith.constant 0 : index
    %50 = vector.load %arg2[%c0_14, %c0_15] : memref<4x128xf32, #tpu.memory_space<vmem>>, vector<1x64xf32>
    %cst_16 = arith.constant 9.99999974E-6 : f32
    %51 = vector.broadcast %cst_16 : f32 to vector<1x64xf32>
    %52 = arith.addf %49, %51 : vector<1x64xf32>
    %53 = math.rsqrt %52 : vector<1x64xf32>
    %54 = arith.mulf %50, %53 : vector<1x64xf32>
    %c1 = arith.constant 1 : index
    %c0_17 = arith.constant 0 : index
    %55 = vector.load %arg2[%c1, %c0_17] : memref<4x128xf32, #tpu.memory_space<vmem>>, vector<1x64xf32>
    %56 = arith.mulf %46, %54 : vector<1x64xf32>
    %57 = arith.subf %55, %56 : vector<1x64xf32>
    %58 = vector.broadcast %54 : vector<1x64xf32> to vector<32x64xf32>
    %59 = arith.mulf %0, %58 : vector<32x64xf32>
    %60 = vector.broadcast %57 : vector<1x64xf32> to vector<32x64xf32>
    %61 = arith.addf %59, %60 : vector<32x64xf32>
    %cst_18 = arith.constant 0.000000e+00 : f32
    %62 = vector.broadcast %cst_18 : f32 to vector<32x64xf32>
    %63 = arith.maximumf %61, %62 : vector<32x64xf32>
    %64 = tpu.iota {dimensions = array<i32: 0>} : vector<32x1xi32>
    %c16_i32 = arith.constant 16 : i32
    %c0_i32_19 = arith.constant 0 : i32
    %65 = arith.cmpi eq, %c16_i32, %c0_i32_19 : i32
    %c1_i32_20 = arith.constant 1 : i32
    %66 = arith.select %65, %c1_i32_20, %c16_i32 : i32
    %67 = vector.broadcast %66 : i32 to vector<32x1xi32>
    %68 = arith.remsi %64, %67 : vector<32x1xi32>
    %c0_i32_21 = arith.constant 0 : i32
    %69 = vector.broadcast %c0_i32_21 : i32 to vector<32x1xi32>
    %70 = arith.cmpi ne, %68, %69 : vector<32x1xi32>
    %c0_i32_22 = arith.constant 0 : i32
    %71 = vector.broadcast %c0_i32_22 : i32 to vector<32x1xi32>
    %72 = arith.cmpi slt, %68, %71 : vector<32x1xi32>
    %c0_i32_23 = arith.constant 0 : i32
    %73 = arith.cmpi slt, %66, %c0_i32_23 : i32
    %74 = vector.broadcast %73 : i1 to vector<32x1xi1>
    %75 = vector.broadcast %74 : vector<32x1xi1> to vector<32x1xi1>
    %76 = arith.xori %72, %75 : vector<32x1xi1>
    %77 = arith.andi %76, %70 : vector<32x1xi1>
    %78 = vector.broadcast %66 : i32 to vector<32x1xi32>
    %79 = arith.addi %68, %78 : vector<32x1xi32>
    %80 = arith.select %77, %79, %68 : vector<32x1xi1>, vector<32x1xi32>
    %c0_i32_24 = arith.constant 0 : i32
    %81 = vector.broadcast %c0_i32_24 : i32 to vector<32x1xi32>
    %82 = arith.cmpi eq, %80, %81 : vector<32x1xi32>
    %c1_i32_25 = arith.constant 1 : i32
    %83 = tpu.dynamic_rotate %63 by %c1_i32_25 dim 0 : vector<32x64xf32>, i32 -> vector<32x64xf32>
    %cst_26 = arith.constant 0.000000e+00 : f32
    %84 = vector.shape_cast %82 : vector<32x1xi1> to vector<32x1xi1>
    %85 = vector.broadcast %84 : vector<32x1xi1> to vector<32x64xi1>
    %86 = vector.broadcast %cst_26 : f32 to vector<32x64xf32>
    %87 = arith.select %85, %86, %83 : vector<32x64xi1>, vector<32x64xf32>
    %c15_i32 = arith.constant 15 : i32
    %88 = vector.broadcast %c15_i32 : i32 to vector<32x1xi32>
    %89 = arith.cmpi eq, %80, %88 : vector<32x1xi32>
    %c31_i32 = arith.constant 31 : i32
    %90 = tpu.dynamic_rotate %63 by %c31_i32 dim 0 : vector<32x64xf32>, i32 -> vector<32x64xf32>
    %cst_27 = arith.constant 0.000000e+00 : f32
    %91 = vector.shape_cast %89 : vector<32x1xi1> to vector<32x1xi1>
    %92 = vector.broadcast %91 : vector<32x1xi1> to vector<32x64xi1>
    %93 = vector.broadcast %cst_27 : f32 to vector<32x64xf32>
    %94 = arith.select %92, %93, %90 : vector<32x64xi1>, vector<32x64xf32>
    %95 = tpu.concatenate %87, %63, %94 in 1 : vector<32x64xf32>, vector<32x64xf32>, vector<32x64xf32> -> vector<32x192xf32>
    %c0_28 = arith.constant 0 : index
    %c0_29 = arith.constant 0 : index
    %96 = vector.load %arg1[%c0_28, %c0_29] : memref<192x128xf32, #tpu.memory_space<vmem>>, vector<192x128xf32>
    %cst_30 = arith.constant dense<0.000000e+00> : vector<32x128xf32>
    %97 = tpu.matmul %95, %96, %cst_30 {dimension_numbers = #tpu.dot_dimension_numbers<[1], [0], [0], [1], [0, 0, 1, 1], [], []>} : vector<32x192xf32>, vector<192x128xf32>, vector<32x128xf32> -> vector<32x128xf32>
    %cst_31 = arith.constant dense<0.000000e+00> : vector<128xf32>
    %98 = vector.multi_reduction <add>, %97, %cst_31 [0] : vector<32x128xf32> to vector<128xf32>
    %99 = vector.shape_cast %98 : vector<128xf32> to vector<1x128xf32>
    %100 = arith.mulf %97, %97 : vector<32x128xf32>
    %cst_32 = arith.constant dense<0.000000e+00> : vector<128xf32>
    %101 = vector.multi_reduction <add>, %100, %cst_32 [0] : vector<32x128xf32> to vector<128xf32>
    %102 = vector.shape_cast %101 : vector<128xf32> to vector<1x128xf32>
    %103 = tpu.concatenate %99, %102 in 0 : vector<1x128xf32>, vector<1x128xf32> -> vector<2x128xf32>
    %104 = tpu.iota {dimensions = array<i32: 0>} : vector<128x128xi32>
    %105 = tpu.iota {dimensions = array<i32: 1>} : vector<128x128xi32>
    %c8_i32 = arith.constant 8 : i32
    %c0_i32_33 = arith.constant 0 : i32
    %106 = arith.cmpi eq, %c8_i32, %c0_i32_33 : i32
    %c1_i32_34 = arith.constant 1 : i32
    %107 = arith.select %106, %c1_i32_34, %c8_i32 : i32
    %108 = vector.broadcast %107 : i32 to vector<128x128xi32>
    %109 = arith.remsi %104, %108 : vector<128x128xi32>
    %c0_i32_35 = arith.constant 0 : i32
    %110 = vector.broadcast %c0_i32_35 : i32 to vector<128x128xi32>
    %111 = arith.cmpi ne, %109, %110 : vector<128x128xi32>
    %c0_i32_36 = arith.constant 0 : i32
    %112 = vector.broadcast %c0_i32_36 : i32 to vector<128x128xi32>
    %113 = arith.cmpi slt, %109, %112 : vector<128x128xi32>
    %c0_i32_37 = arith.constant 0 : i32
    %114 = arith.cmpi slt, %107, %c0_i32_37 : i32
    %115 = vector.broadcast %114 : i1 to vector<128x128xi1>
    %116 = vector.broadcast %115 : vector<128x128xi1> to vector<128x128xi1>
    %117 = arith.xori %113, %116 : vector<128x128xi1>
    %118 = arith.andi %117, %111 : vector<128x128xi1>
    %119 = vector.broadcast %107 : i32 to vector<128x128xi32>
    %120 = arith.addi %109, %119 : vector<128x128xi32>
    %121 = arith.select %118, %120, %109 : vector<128x128xi1>, vector<128x128xi32>
    %c8_i32_38 = arith.constant 8 : i32
    %c0_i32_39 = arith.constant 0 : i32
    %122 = arith.cmpi eq, %c8_i32_38, %c0_i32_39 : i32
    %c1_i32_40 = arith.constant 1 : i32
    %123 = arith.select %122, %c1_i32_40, %c8_i32_38 : i32
    %124 = vector.broadcast %123 : i32 to vector<128x128xi32>
    %125 = arith.remsi %105, %124 : vector<128x128xi32>
    %c0_i32_41 = arith.constant 0 : i32
    %126 = vector.broadcast %c0_i32_41 : i32 to vector<128x128xi32>
    %127 = arith.cmpi ne, %125, %126 : vector<128x128xi32>
    %c0_i32_42 = arith.constant 0 : i32
    %128 = vector.broadcast %c0_i32_42 : i32 to vector<128x128xi32>
    %129 = arith.cmpi slt, %125, %128 : vector<128x128xi32>
    %c0_i32_43 = arith.constant 0 : i32
    %130 = arith.cmpi slt, %123, %c0_i32_43 : i32
    %131 = vector.broadcast %130 : i1 to vector<128x128xi1>
    %132 = vector.broadcast %131 : vector<128x128xi1> to vector<128x128xi1>
    %133 = arith.xori %129, %132 : vector<128x128xi1>
    %134 = arith.andi %133, %127 : vector<128x128xi1>
    %135 = vector.broadcast %123 : i32 to vector<128x128xi32>
    %136 = arith.addi %125, %135 : vector<128x128xi32>
    %137 = arith.select %134, %136, %125 : vector<128x128xi1>, vector<128x128xi32>
    %138 = arith.cmpi eq, %121, %137 : vector<128x128xi32>
    %cst_44 = arith.constant 0.001953125 : f32
    %cst_45 = arith.constant 0.000000e+00 : f32
    %139 = vector.broadcast %cst_44 : f32 to vector<128x128xf32>
    %140 = vector.broadcast %cst_45 : f32 to vector<128x128xf32>
    %141 = arith.select %138, %139, %140 : vector<128x128xi1>, vector<128x128xf32>
    %cst_46 = arith.constant dense<0.000000e+00> : vector<2x128xf32>
    %142 = tpu.matmul %103, %141, %cst_46 {dimension_numbers = #tpu.dot_dimension_numbers<[1], [0], [0], [1], [0, 0, 1, 1], [], []>} : vector<2x128xf32>, vector<128x128xf32>, vector<2x128xf32> -> vector<2x128xf32>
    %143 = vector.extract_strided_slice %142 {offsets = [0, 0], sizes = [1, 128], strides = [1, 1]} : vector<2x128xf32> to vector<1x128xf32>
    %144 = vector.extract_strided_slice %142 {offsets = [1, 0], sizes = [1, 128], strides = [1, 1]} : vector<2x128xf32> to vector<1x128xf32>
    %145 = arith.mulf %143, %143 : vector<1x128xf32>
    %146 = arith.subf %144, %145 : vector<1x128xf32>
    %c2 = arith.constant 2 : index
    %c0_47 = arith.constant 0 : index
    %147 = vector.load %arg2[%c2, %c0_47] : memref<4x128xf32, #tpu.memory_space<vmem>>, vector<1x128xf32>
    %cst_48 = arith.constant 9.99999974E-6 : f32
    %148 = vector.broadcast %cst_48 : f32 to vector<1x128xf32>
    %149 = arith.addf %146, %148 : vector<1x128xf32>
    %150 = math.rsqrt %149 : vector<1x128xf32>
    %151 = arith.mulf %147, %150 : vector<1x128xf32>
    %c3 = arith.constant 3 : index
    %c0_49 = arith.constant 0 : index
    %152 = vector.load %arg2[%c3, %c0_49] : memref<4x128xf32, #tpu.memory_space<vmem>>, vector<1x128xf32>
    %153 = arith.mulf %143, %151 : vector<1x128xf32>
    %154 = arith.subf %152, %153 : vector<1x128xf32>
    %155 = vector.broadcast %151 : vector<1x128xf32> to vector<32x128xf32>
    %156 = arith.mulf %97, %155 : vector<32x128xf32>
    %157 = vector.broadcast %154 : vector<1x128xf32> to vector<32x128xf32>
    %158 = arith.addf %156, %157 : vector<32x128xf32>
    %cst_50 = arith.constant 0.000000e+00 : f32
    %159 = vector.broadcast %cst_50 : f32 to vector<32x128xf32>
    %160 = arith.maximumf %158, %159 : vector<32x128xf32>
    %c0_51 = arith.constant 0 : index
    %c0_52 = arith.constant 0 : index
    %161 = vector.load %arg3[%c0_51, %c0_52] : memref<32x128xf32, #tpu.memory_space<vmem>>, vector<32x128xf32>
    tpu.vector_store %arg3[%c0_51, %c0_52], %160 {strides = array<i32>} : memref<32x128xf32, #tpu.memory_space<vmem>>, vector<32x128xf32>,
    return
  }
}

</mosaic_0001>

<bundles_post_ra>
// kernel: tile.23
= control target key start
LH: loop header
LB: loop body
LE: loop exit
PB: predicated region body
PF: predicated region fallthrough
CT: control target
= control target key end

     0   :  { %s28_s0 = inlined_call_operand.vmem [shape: f32[4], index: 0, kind: input, shape index: {}]   ;;  %s29_s1 = inlined_call_operand.vmem [shape: f32[16,4], index: 1, kind: output, shape index: {}]  }
   0x1   :  { %v4_v0 = vld [vmem:[%s28_s0] ss:$0 sm:$0xff] }
   0x2   :  { %5 = vst [vmem:[%s29_s1] sm:$0xff] %v4_v0 }
   0x3   :  { %8 = vst [vmem:[%s29_s1 + $0x8] sm:$0xff] %v4_v0 }

// kernel: tile.28
= control target key start
LH: loop header
LB: loop body
LE: loop exit
PB: predicated region body
PF: predicated region fallthrough
CT: control target
= control target key end

     0   :  { %s131_s10 = smov 60   ;;  %s132_s11 = smov 52   ;;  %vm3_vm0 = vcmask 31744   ;;  %vm9_vm1 = vcmask 523744   ;;  %vm15_vm2 = vcmask 490944   ;;  %vm21_vm3 = vcmask 458144   ;;  %s207_s0 = inlined_call_operand.vmem [shape: f32[16,4], index: 0, kind: input, shape index: {}]   ;;  %s208_s1 = inlined_call_operand.vmem [shape: f32[1,64], index: 1, kind: output, shape index: {}]  }
   0x1   :  { %v101_v0 = vld [vmem:[%s207_s0 + $0xf] sm:$0x1]   ;;  %v103_v1 = vld [vmem:[%s207_s0 + $0xd] sm:$0x1]   ;;  %v105_v2 = vld [vmem:[%s207_s0 + $0xb] sm:$0x1]  }
   0x2   :  { %7 = vrot.lane.b32.xlu0 %v101_v0, %s131_s10  ;;  %19 = vrot.lane.b32.xlu1 %v103_v1, %s132_s11  ;;  %s133_s14 = smov 44   ;;  %v102_v3 = vld [vmem:[%s207_s0 + $0xe] sm:$0x1]   ;;  %v104_v4 = vld [vmem:[%s207_s0 + $0xc] sm:$0x1]   ;;  %s134_s19 = smov 56  }
   0x3   :  { %31 = vrot.lane.b32.xlu2 %v105_v2, %s133_s14  ;;  %s135_s20 = smov 48   ;;  %v106_v5 = vld [vmem:[%s207_s0 + $0xa] sm:$0x1]   ;;  %s136_s23 = smov 40   ;;  %v107_v6 = vld [vmem:[%s207_s0 + $0x9] sm:$0x1]  }
   0x4   :  { %v108_v7 = vld [vmem:[%s207_s0 + $0x8] sm:$0x1]   ;;  %s137_s28 = smov 36   ;;  %s138_s29 = smov 32   ;;  %v109_v8 = vld [vmem:[%s207_s0 + $0x7] sm:$0x1]  }
   0x5   :  { %s139_s3 = smov 28   ;;  %v110_v9 = vld [vmem:[%s207_s0 + $0x6] sm:$0x1]   ;;  %v111_v10 = vld [vmem:[%s207_s0 + $0x5] sm:$0x1]   ;;  %s140_s8 = smov 24  }
   0x6   :  { %s141_s9 = smov 20   ;;  %v112_v11 = vld [vmem:[%s207_s0 + $0x4] sm:$0x1]   ;;  %s142_s12 = smov 16   ;;  %v113_v12 = vld [vmem:[%s207_s0 + $0x3] sm:$0x1]  }
   0x7   :  { %v114_v13 = vld [vmem:[%s207_s0 + $0x2] sm:$0x1]   ;;  %s143_s17 = smov 12   ;;  %s144_s18 = smov 8   ;;  %v115_v14 = vld [vmem:[%s207_s0 + $0x1] sm:$0x1]  }
   0x8   :  { %s145_s21 = smov 4   ;;  %v2_v15 = vld [vmem:[%s207_s0] sm:$0x1]   ;;  %vm27_vm4 = vcmask 425344   ;;  %vm33_vm5 = vcmask 392544   ;;  %vm39_vm6 = vcmask 359744  }
   0x9   :  { %4 = vst.msk [vmem:[#allocation0] sm:$0x1] %vm3_vm0, %v2_v15   ;;  %vm45_vm7 = vcmask 326944   ;;  %vm51_vm8 = vcmask 294144   ;;  %vm57_vm9 = vcmask 261344   ;;  %vm63_vm10 = vcmask 228544  }
   0xa   :  { %13 = vrot.lane.b32.xlu0 %v102_v3, %s134_s19  ;;  %25 = vrot.lane.b32.xlu1 %v104_v4, %s135_s20  ;;  %vm69_vm11 = vcmask 195744   ;;  %vm75_vm12 = vcmask 162944   ;;  %vm81_vm13 = vcmask 130144   ;;  %vm87_vm14 = vcmask 97344  }
   0xb   :  { %37 = vrot.lane.b32.xlu2 %v106_v5, %s136_s23  ;;  %vm93_vm15 = vcmask 64544  }
  0x12   :  { %43 = vrot.lane.b32.xlu0 %v107_v6, %s137_s28  ;;  %49 = vrot.lane.b32.xlu1 %v108_v7, %s138_s29 }
  0x13   :  { %55 = vrot.lane.b32.xlu2 %v109_v8, %s139_s3 }
  0x1a   :  { %61 = vrot.lane.b32.xlu0 %v110_v9, %s140_s8  ;;  %67 = vrot.lane.b32.xlu1 %v111_v10, %s141_s9 }
  0x1b   :  { %73 = vrot.lane.b32.xlu2 %v112_v11, %s142_s12 }
  0x22   :  { %79 = vrot.lane.b32.xlu0 %v113_v12, %s143_s17  ;;  %85 = vrot.lane.b32.xlu1 %v114_v13, %s144_s18 }
  0x23   :  { %91 = vrot.lane.b32.xlu2 %v115_v14, %s145_s21 }
  0x5d   :  { %v32_v16 = vpop.permute.xlu2 %31  }
  0x65   :  { %v38_v17 = vpop.permute.xlu2 %37  }
  0x6d   :  { %v56_v18 = vpop.permute.xlu2 %55  }
  0x74   :  { %v8_v19 = vpop.permute.xlu0 %7   ;;  %v20_v20 = vpop.permute.xlu1 %19  }
  0x75   :  { %10 = vst.msk [vmem:[#allocation0] sm:$0x1] %vm9_vm1, %v8_v19   ;;  %v74_v21 = vpop.permute.xlu2 %73  }
  0x7c   :  { %v14_v22 = vpop.permute.xlu0 %13   ;;  %v26_v23 = vpop.permute.xlu1 %25  }
  0x7d   :  { %16 = vst.msk [vmem:[#allocation0] sm:$0x1] %vm15_vm2, %v14_v22   ;;  %v92_v24 = vpop.permute.xlu2 %91  }
  0x7e   :  { %22 = vst.msk [vmem:[#allocation0] sm:$0x1] %vm21_vm3, %v20_v20  }
  0x7f   :  { %28 = vst.msk [vmem:[#allocation0] sm:$0x1] %vm27_vm4, %v26_v23  }
  0x80   :  { %34 = vst.msk [vmem:[#allocation0] sm:$0x1] %vm33_vm5, %v32_v16  }
  0x81   :  { %40 = vst.msk [vmem:[#allocation0] sm:$0x1] %vm39_vm6, %v38_v17  }
  0x84   :  { %v44_v25 = vpop.permute.xlu0 %43   ;;  %v50_v26 = vpop.permute.xlu1 %49  }
  0x85   :  { %46 = vst.msk [vmem:[#allocation0] sm:$0x1] %vm45_vm7, %v44_v25  }
  0x86   :  { %52 = vst.msk [vmem:[#allocation0] sm:$0x1] %vm51_vm8, %v50_v26  }
  0x87   :  { %58 = vst.msk [vmem:[#allocation0] sm:$0x1] %vm57_vm9, %v56_v18  }
  0x8c   :  { %v62_v27 = vpop.permute.xlu0 %61   ;;  %v68_v28 = vpop.permute.xlu1 %67  }
  0x8d   :  { %64 = vst.msk [vmem:[#allocation0] sm:$0x1] %vm63_vm10, %v62_v27  }
  0x8e   :  { %70 = vst.msk [vmem:[#allocation0] sm:$0x1] %vm69_vm11, %v68_v28  }
  0x8f   :  { %76 = vst.msk [vmem:[#allocation0] sm:$0x1] %vm75_vm12, %v74_v21  }
  0x94   :  { %v80_v29 = vpop.permute.xlu0 %79   ;;  %v86_v30 = vpop.permute.xlu1 %85  }
  0x95   :  { %82 = vst.msk [vmem:[#allocation0] sm:$0x1] %vm81_vm13, %v80_v29  }
  0x96   :  { %88 = vst.msk [vmem:[#allocation0] sm:$0x1] %vm87_vm14, %v86_v30  }
  0x97   :  { %94 = vst.msk [vmem:[#allocation0] sm:$0x1] %vm93_vm15, %v92_v24  }
  0x9e   :  { %v97_v31 = vld [vmem:[#allocation0] sm:$0x1] }
  0x9f   :  { %100 = vst [vmem:[%s208_s1] sm:$0x1] %v97_v31 }

// kernel: tile.33
= control target key start
LH: loop header
LB: loop body
LE: loop exit
PB: predicated region body
PF: predicated region fallthrough
CT: control target
= control target key end

     0   :  { %s28_s0 = inlined_call_operand.vmem [shape: f32[8], index: 0, kind: input, shape index: {}]   ;;  %s29_s1 = inlined_call_operand.vmem [shape: f32[16,8], index: 1, kind: output, shape index: {}]  }
   0x1   :  { %v4_v0 = vld [vmem:[%s28_s0] ss:$0 sm:$0xff] }
   0x2   :  { %5 = vst [vmem:[%s29_s1] sm:$0xff] %v4_v0 }
   0x3   :  { %8 = vst [vmem:[%s29_s1 + $0x8] sm:$0xff] %v4_v0 }

// kernel: tile.38
= control target key start
LH: loop header
LB: loop body
LE: loop exit
PB: predicated region body
PF: predicated region fallthrough
CT: control target
= control target key end

     0   :  { %s131_s10 = smov 120   ;;  %s132_s11 = smov 104   ;;  %vm3_vm0 = vcmask 64512   ;;  %vm9_vm1 = vcmask 1048512   ;;  %vm15_vm2 = vcmask 982912   ;;  %vm21_vm3 = vcmask 917312   ;;  %s207_s0 = inlined_call_operand.vmem [shape: f32[16,8], index: 0, kind: input, shape index: {}]   ;;  %s208_s1 = inlined_call_operand.vmem [shape: f32[1,128], index: 1, kind: output, shape index: {}]  }
   0x1   :  { %v101_v0 = vld [vmem:[%s207_s0 + $0xf] sm:$0x1]   ;;  %v103_v1 = vld [vmem:[%s207_s0 + $0xd] sm:$0x1]   ;;  %v105_v2 = vld [vmem:[%s207_s0 + $0xb] sm:$0x1]  }
   0x2   :  { %7 = vrot.lane.b32.xlu0 %v101_v0, %s131_s10  ;;  %19 = vrot.lane.b32.xlu1 %v103_v1, %s132_s11  ;;  %s133_s14 = smov 88   ;;  %v102_v3 = vld [vmem:[%s207_s0 + $0xe] sm:$0x1]   ;;  %v104_v4 = vld [vmem:[%s207_s0 + $0xc] sm:$0x1]   ;;  %s134_s19 = smov 112  }
   0x3   :  { %31 = vrot.lane.b32.xlu2 %v105_v2, %s133_s14  ;;  %s135_s20 = smov 96   ;;  %v106_v5 = vld [vmem:[%s207_s0 + $0xa] sm:$0x1]   ;;  %s136_s23 = smov 80   ;;  %v107_v6 = vld [vmem:[%s207_s0 + $0x9] sm:$0x1]  }
   0x4   :  { %v108_v7 = vld [vmem:[%s207_s0 + $0x8] sm:$0x1]   ;;  %s137_s28 = smov 72   ;;  %s138_s29 = smov 64   ;;  %v109_v8 = vld [vmem:[%s207_s0 + $0x7] sm:$0x1]  }
   0x5   :  { %s139_s3 = smov 56   ;;  %v110_v9 = vld [vmem:[%s207_s0 + $0x6] sm:$0x1]   ;;  %v111_v10 = vld [vmem:[%s207_s0 + $0x5] sm:$0x1]   ;;  %s140_s8 = smov 48  }
   0x6   :  { %s141_s9 = smov 40   ;;  %v112_v11 = vld [vmem:[%s207_s0 + $0x4] sm:$0x1]   ;;  %s142_s12 = smov 32   ;;  %v113_v12 = vld [vmem:[%s207_s0 + $0x3] sm:$0x1]  }
   0x7   :  { %v114_v13 = vld [vmem:[%s207_s0 + $0x2] sm:$0x1]   ;;  %s143_s17 = smov 24   ;;  %s144_s18 = smov 16   ;;  %v115_v14 = vld [vmem:[%s207_s0 + $0x1] sm:$0x1]  }
   0x8   :  { %s145_s21 = smov 8   ;;  %v2_v15 = vld [vmem:[%s207_s0] sm:$0x1]   ;;  %vm27_vm4 = vcmask 851712   ;;  %vm33_vm5 = vcmask 786112   ;;  %vm39_vm6 = vcmask 720512  }
   0x9   :  { %4 = vst.msk [vmem:[#allocation0] sm:$0x1] %vm3_vm0, %v2_v15   ;;  %vm45_vm7 = vcmask 654912   ;;  %vm51_vm8 = vcmask 589312   ;;  %vm57_vm9 = vcmask 523712   ;;  %vm63_vm10 = vcmask 458112  }
   0xa   :  { %13 = vrot.lane.b32.xlu0 %v102_v3, %s134_s19  ;;  %25 = vrot.lane.b32.xlu1 %v104_v4, %s135_s20  ;;  %vm69_vm11 = vcmask 392512   ;;  %vm75_vm12 = vcmask 326912   ;;  %vm81_vm13 = vcmask 261312   ;;  %vm87_vm14 = vcmask 195712  }
   0xb   :  { %37 = vrot.lane.b32.xlu2 %v106_v5, %s136_s23  ;;  %vm93_vm15 = vcmask 130112  }
  0x12   :  { %43 = vrot.lane.b32.xlu0 %v107_v6, %s137_s28  ;;  %49 = vrot.lane.b32.xlu1 %v108_v7, %s138_s29 }
  0x13   :  { %55 = vrot.lane.b32.xlu2 %v109_v8, %s139_s3 }
  0x1a   :  { %61 = vrot.lane.b32.xlu0 %v110_v9, %s140_s8  ;;  %67 = vrot.lane.b32.xlu1 %v111_v10, %s141_s9 }
  0x1b   :  { %73 = vrot.lane.b32.xlu2 %v112_v11, %s142_s12 }
  0x22   :  { %79 = vrot.lane.b32.xlu0 %v113_v12, %s143_s17  ;;  %85 = vrot.lane.b32.xlu1 %v114_v13, %s144_s18 }
  0x23   :  { %91 = vrot.lane.b32.xlu2 %v115_v14, %s145_s21 }
  0x5d   :  { %v32_v16 = vpop.permute.xlu2 %31  }
  0x65   :  { %v38_v17 = vpop.permute.xlu2 %37  }
  0x6d   :  { %v56_v18 = vpop.permute.xlu2 %55  }
  0x74   :  { %v8_v19 = vpop.permute.xlu0 %7   ;;  %v20_v20 = vpop.permute.xlu1 %19  }
  0x75   :  { %10 = vst.msk [vmem:[#allocation0] sm:$0x1] %vm9_vm1, %v8_v19   ;;  %v74_v21 = vpop.permute.xlu2 %73  }
  0x7c   :  { %v14_v22 = vpop.permute.xlu0 %13   ;;  %v26_v23 = vpop.permute.xlu1 %25  }
  0x7d   :  { %16 = vst.msk [vmem:[#allocation0] sm:$0x1] %vm15_vm2, %v14_v22   ;;  %v92_v24 = vpop.permute.xlu2 %91  }
  0x7e   :  { %22 = vst.msk [vmem:[#allocation0] sm:$0x1] %vm21_vm3, %v20_v20  }
  0x7f   :  { %28 = vst.msk [vmem:[#allocation0] sm:$0x1] %vm27_vm4, %v26_v23  }
  0x80   :  { %34 = vst.msk [vmem:[#allocation0] sm:$0x1] %vm33_vm5, %v32_v16  }
  0x81   :  { %40 = vst.msk [vmem:[#allocation0] sm:$0x1] %vm39_vm6, %v38_v17  }
  0x84   :  { %v44_v25 = vpop.permute.xlu0 %43   ;;  %v50_v26 = vpop.permute.xlu1 %49  }
  0x85   :  { %46 = vst.msk [vmem:[#allocation0] sm:$0x1] %vm45_vm7, %v44_v25  }
  0x86   :  { %52 = vst.msk [vmem:[#allocation0] sm:$0x1] %vm51_vm8, %v50_v26  }
  0x87   :  { %58 = vst.msk [vmem:[#allocation0] sm:$0x1] %vm57_vm9, %v56_v18  }
  0x8c   :  { %v62_v27 = vpop.permute.xlu0 %61   ;;  %v68_v28 = vpop.permute.xlu1 %67  }
  0x8d   :  { %64 = vst.msk [vmem:[#allocation0] sm:$0x1] %vm63_vm10, %v62_v27  }
  0x8e   :  { %70 = vst.msk [vmem:[#allocation0] sm:$0x1] %vm69_vm11, %v68_v28  }
  0x8f   :  { %76 = vst.msk [vmem:[#allocation0] sm:$0x1] %vm75_vm12, %v74_v21  }
  0x94   :  { %v80_v29 = vpop.permute.xlu0 %79   ;;  %v86_v30 = vpop.permute.xlu1 %85  }
  0x95   :  { %82 = vst.msk [vmem:[#allocation0] sm:$0x1] %vm81_vm13, %v80_v29  }
  0x96   :  { %88 = vst.msk [vmem:[#allocation0] sm:$0x1] %vm87_vm14, %v86_v30  }
  0x97   :  { %94 = vst.msk [vmem:[#allocation0] sm:$0x1] %vm93_vm15, %v92_v24  }
  0x9e   :  { %v97_v31 = vld [vmem:[#allocation0] sm:$0x1] }
  0x9f   :  { %100 = vst [vmem:[%s208_s1] sm:$0x1] %v97_v31 }

// kernel: bn_conv_bn.1
= control target key start
LH: loop header
LB: loop body
LE: loop exit
PB: predicated region body
PF: predicated region fallthrough
CT: control target
= control target key end

     0   :  { %v51_v0 = vlaneseq  ;;  %vm18_vm0 = vcmask 523264   ;;  %v843_v23 = vmov 0.001953125   ;;  %vm49_vm9 = vcmask 1040384   ;;  %s844_s18 = smov 64   ;;  %s1136_s0 = inlined_call_operand.vmem [shape: f32[32,64], index: 0, kind: input, shape index: {}]   ;;  %s1137_s1 = inlined_call_operand.vmem [shape: f32[192,128], index: 1, kind: input, shape index: {}]   ;;  %s1138_s2 = inlined_call_operand.vmem [shape: f32[4,128], index: 2, kind: input, shape index: {}]   ;;  %s1139_s3 = inlined_call_operand.vmem [shape: f32[32,128], index: 3, kind: output, shape index: {}]  }
   0x1   :  { %v872_v3 = vld [vmem:[%s1136_s0] sm:$0xff]  ;;  %v877_v4 = vld [vmem:[%s1136_s0 + $0x8] sm:$0xff]  ;;  %v904_v15 = vld [vmem:[%s1136_s0 + $0x10] sm:$0xff] }
   0x2   :  { %v865_v1 = vshrl.u32 %v51_v0, 7  ;;  %v867_v2 = vand.u32 127, %v51_v0  ;;  %v19_v5 = vsel %vm18_vm0, %v872_v3, 0.0  ;;  %v20_v6 = vsel %vm18_vm0, %v877_v4, 0.0  ;;  %v918_v22 = vld [vmem:[%s1136_s0 + $0x18] sm:$0xff]  ;;  %v387_v56 = vld [vmem:[%s1137_s1 + $0xb0] sm:$0xff] }
   0x3   :  { %v21_v16 = vadd.f32 %v20_v6, %v19_v5  ;;  %v22_v19 = vsel %vm18_vm0, %v904_v15, 0.0  ;;  %v32_v20 = vmul.f32 %v872_v3, %v872_v3  ;;  %v24_v26 = vsel %vm18_vm0, %v918_v22, 0.0  ;;  %v388_v55 = vld [vmem:[%s1137_s1 + $0xb8] sm:$0xff]  ;;  %v386_v58 = vld [vmem:[%s1137_s1 + $0xa8] sm:$0xff]  ;;  %v385_v60 = vld [vmem:[%s1137_s1 + $0xa0] sm:$0xff] }
   0x4   :  { %v884_v7 = vadd.s32 56, %v865_v1  ;;  %v162_v8 = vand.u32 3, %v867_v2  ;;  %v888_v9 = vadd.s32 48, %v865_v1  ;;  %v891_v10 = vadd.s32 40, %v865_v1  ;;  %438 = vmatpush.msra.mxu2 %v388_v55  ;;  %v384_v62 = vld [vmem:[%s1137_s1 + $0x98] sm:$0xff]  ;;  %v383_v63 = vld [vmem:[%s1137_s1 + $0x90] sm:$0xff] }
   0x5   :  { %v894_v11 = vadd.s32 32, %v865_v1  ;;  %v897_v12 = vadd.s32 24, %v865_v1  ;;  %v908_v18 = vadd.s32 16, %v865_v1  ;;  %v923_v25 = vadd.s32 8, %v865_v1  ;;  %v382_v5 = vld [vmem:[%s1137_s1 + $0x88] sm:$0xff] }
   0x6   :  { %v115_v13 = vand.u32 3, %v884_v7  ;;  %v108_v14 = vand.u32 3, %v888_v9  ;;  %v101_v17 = vand.u32 3, %v891_v10  ;;  %v23_v27 = vadd.f32 %v22_v19, %v21_v16  ;;  %439 = vmatpush.msra.mxu2 %v387_v56  ;;  %v375_v56 = vld [vmem:[%s1137_s1 + $0x50] sm:$0xff] }
   0x7   :  { %v94_v21 = vand.u32 3, %v894_v11  ;;  %v87_v24 = vand.u32 3, %v897_v12  ;;  %v33_v28 = vmul.f32 %v877_v4, %v877_v4  ;;  %v34_v29 = vmul.f32 %v904_v15, %v904_v15 }
   0x8   :  { %vm177_vm1 = vcmp.eq.s32.totalorder %v115_v13, %v162_v8  ;;  %vm176_vm2 = vcmp.eq.s32.totalorder %v108_v14, %v162_v8  ;;  %vm175_vm3 = vcmp.eq.s32.totalorder %v101_v17, %v162_v8  ;;  %v80_v30 = vand.u32 3, %v908_v18  ;;  %440 = vmatpush.msra.mxu2 %v386_v58 }
   0x9   :  { %792 = vmatpush.msk.msra.mxu0 %vm177_vm1, %v843_v23  ;;  %v35_v31 = vmul.f32 %v918_v22, %v918_v22  ;;  %v36_v32 = vsel %vm18_vm0, %v32_v20, 0.0  ;;  %vm174_vm4 = vcmp.eq.s32.totalorder %v94_v21, %v162_v8  ;;  %v25_v33 = vadd.f32 %v24_v26, %v23_v27  ;;  %v214_v21 = vld [vmem:[%s1138_s2] sm:$0x1] }
   0xa   :  { %v37_v34 = vsel %vm18_vm0, %v33_v28, 0.0  ;;  %v39_v35 = vsel %vm18_vm0, %v34_v29, 0.0  ;;  %vm173_vm5 = vcmp.eq.s32.totalorder %v87_v24, %v162_v8  ;;  %v73_v37 = vand.u32 3, %v923_v25  ;;  %441 = vmatpush.msra.mxu2 %v385_v60  ;;  %v230_v28 = vld [vmem:[%s1138_s2 + $0x1] sm:$0x1]  ;;  %v374_v60 = vld [vmem:[%s1137_s1 + $0x48] sm:$0xff] }
   0xb   :  { %793 = vmatpush.msk.msra.mxu0 %vm176_vm2, %v843_v23  ;;  %v38_v36 = vadd.f32 %v37_v34, %v36_v32  ;;  %v26_v38 = vrot.slane %v25_v33, 4  ;;  %v41_v39 = vsel %vm18_vm0, %v35_v31, 0.0  ;;  %vm172_vm6 = vcmp.eq.s32.totalorder %v80_v30, %v162_v8 }
   0xc   :  { %v66_v41 = vand.u32 3, %v865_v1  ;;  %vm171_vm7 = vcmp.eq.s32.totalorder %v73_v37, %v162_v8  ;;  %442 = vmatpush.msra.mxu2 %v384_v62  ;;  %v380_v37 = vld [vmem:[%s1137_s1 + $0x78] sm:$0xff]  ;;  %vm328_vm13 = vcmp.lt.s32.totalorder %v865_v1, 7  ;;  %vm303_vm14 = vcmp.lt.s32.totalorder %v865_v1, 1  ;;  %v373_v62 = vld [vmem:[%s1137_s1 + $0x40] sm:$0xff] }
   0xd   :  { %794 = vmatpush.msk.msra.mxu0 %vm175_vm3, %v843_v23  ;;  %v40_v40 = vadd.f32 %v39_v35, %v38_v36  ;;  %v27_v42 = vadd.f32 %v26_v38, %v25_v33  ;;  %v379_v38 = vld [vmem:[%s1137_s1 + $0x70] sm:$0xff]  ;;  %821 = vmatpush.msra.mxu1 %v380_v37 }
   0xe   :  { %vm170_vm8 = vcmp.eq.s32.totalorder %v66_v41, %v162_v8  ;;  %443 = vmatpush.msra.mxu2 %v383_v63  ;;  %v381_v8 = vld [vmem:[%s1137_s1 + $0x80] sm:$0xff] }
   0xf   :  { %795 = vmatpush.msk.msra.mxu0 %vm174_vm4, %v843_v23  ;;  %v42_v43 = vadd.f32 %v41_v39, %v40_v40  ;;  %v28_v44 = vrot.slane %v27_v42, 2  ;;  %822 = vmatpush.msra.mxu1 %v379_v38 }
  0x10   :  { %444 = vmatpush.msra.mxu2 %v382_v5  ;;  %v371_v5 = vld [vmem:[%s1137_s1 + $0x30] sm:$0xff] }
  0x11   :  { %796 = vmatpush.msk.msra.mxu0 %vm173_vm5, %v843_v23  ;;  %v43_v45 = vrot.slane %v42_v43, 4  ;;  %v29_v46 = vadd.f32 %v28_v44, %v27_v42 }
  0x12   :  { %445 = vmatpush.msra.mxu2 %v381_v8  ;;  %v370_v8 = vld [vmem:[%s1137_s1 + $0x28] sm:$0xff] }
  0x13   :  { %797 = vmatpush.msk.msra.mxu0 %vm172_vm6, %v843_v23  ;;  %v44_v47 = vadd.f32 %v43_v45, %v42_v43  ;;  %v30_v48 = vrot.slane %v29_v46, 1 }
  0x15   :  { %798 = vmatpush.msk.msra.mxu0 %vm171_vm7, %v843_v23  ;;  %v45_v49 = vrot.slane %v44_v47, 2  ;;  %v31_v51 = vadd.f32 %v30_v48, %v29_v46  ;;  %v377_v48 = vld [vmem:[%s1137_s1 + $0x60] sm:$0xff] }
  0x17   :  { %799 = vmatpush.msk.msra.mxu0 %vm170_vm8, %v843_v23  ;;  %v46_v50 = vadd.f32 %v45_v49, %v44_v47 }
  0x19   :  { %v47_v52 = vrot.slane %v46_v50, 1  ;;  %401 = vmatpush.msrb.mxu0 %v380_v37 }
  0x1b   :  { %v48_v53 = vadd.f32 %v47_v52, %v46_v50  ;;  %402 = vmatpush.msrb.mxu0 %v379_v38  ;;  %v376_v52 = vld [vmem:[%s1137_s1 + $0x58] sm:$0xff] }
  0x1d   :  { %v50_v54 = vsel %vm49_vm9, %v31_v51, %v48_v53 }
  0x1e   :  { %800 = vmatmul.msk.f32.vlgmr.msra.gmra.mxu0 %vm18_vm0, %v50_v54  ;;  %v258_v54 = vand.u32 15, %v923_v25 }
  0x20   :  { %vm321_vm15 = vcmp.eq.s32.totalorder %v258_v54, 15  ;;  %v529_v54 = vand.u32 7, %v891_v10  ;;  %v494_v10 = vand.u32 7, %v865_v1 }
  0x9b   :  { %v206_v57 = vpop.f32.mrf.mxu0 }
  0x9c   :  { %v209_v59 = vmul.f32 %v206_v57, %v206_v57 }
  0x9e   :  { %v211_v61 = vrot.slane %v209_v59, 7 }
  0xa0   :  { %v213_v0 = vsub.f32 %v206_v57, %v211_v61 }
  0xa2   :  { %v215_v6 = vadd.f32 1e-05, %v213_v0  ;;  %v372_v0 = vld [vmem:[%s1137_s1 + $0x38] sm:$0xff] }
  0xa4   :  { %839 = vrsqrt.f32 %v215_v6  ;;  %vm222_vm11 = vweird.f32 %v215_v6 }
  0xaa   :  { %v840_v13 = vpop.eup %839 }
  0xab   :  { %v217_v14 = vmul.f32 %v840_v13, %v215_v6  ;;  %vm223_vm10 = vweird.f32 %v840_v13 }
  0xac   :  { %vm224_vm12 = vmor %vm222_vm11, %vm223_vm10 }
  0xad   :  { %v218_v16 = vmul.f32 %v840_v13, %v217_v14 }
  0xaf   :  { %v219_v17 = vmul.f32 0.5, %v218_v16  ;;  %v272_v16 = vand.u32 15, %v897_v12 }
  0xb1   :  { %v220_v19 = vsub.f32 1.5, %v219_v17  ;;  %v368_v17 = vld [vmem:[%s1137_s1 + $0x18] sm:$0xff]  ;;  %vm323_vm1 = vcmp.eq.s32.totalorder %v272_v16, 15 }
  0xb3   :  { %v221_v20 = vmul.f32 %v840_v13, %v220_v19  ;;  %v367_v19 = vld [vmem:[%s1137_s1 + $0x10] sm:$0xff] }
  0xb5   :  { %v225_v24 = vsel %vm224_vm12, %v840_v13, %v221_v20  ;;  %v369_v13 = vld [vmem:[%s1137_s1 + $0x20] sm:$0xff] }
  0xb6   :  { %v227_v26 = vrot.slane %v225_v24, 1 }
  0xb8   :  { %v229_v27 = vmul.f32 %v227_v26, %v214_v21  ;;  %v366_v21 = vld [vmem:[%s1137_s1 + $0x8] sm:$0xff]  ;;  %v365_v26 = vld [vmem:[%s1137_s1] sm:$0xff] }
  0xba   :  { %v231_v29 = vmul.f32 %v229_v27, %v206_v57  ;;  %v233_v30 = vperm.slane %v229_v27, 0  ;;  %v251_v27 = vand.u32 15, %v865_v1 }
  0xbc   :  { %v232_v31 = vsub.f32 %v230_v28, %v231_v29  ;;  %v235_v32 = vmul.f32 %v233_v30, %v877_v4  ;;  %v234_v34 = vmul.f32 %v233_v30, %v872_v3  ;;  %v236_v35 = vmul.f32 %v233_v30, %v904_v15 }
  0xbd   :  { %v237_v36 = vmul.f32 %v233_v30, %v918_v22  ;;  %v378_v22 = vld [vmem:[%s1137_s1 + $0x68] sm:$0xff]  ;;  %vm295_vm2 = vcmp.eq.s32.totalorder %v251_v27, 0 }
  0xbe   :  { %v238_v33 = vperm.slane %v232_v31, 0  ;;  %403 = vmatpush.msrb.mxu0 %v378_v22  ;;  %823 = vmatpush.msra.mxu1 %v378_v22 }
  0xc0   :  { %v240_v39 = vadd.f32 %v238_v33, %v235_v32  ;;  %v239_v40 = vadd.f32 %v238_v33, %v234_v34  ;;  %v241_v41 = vadd.f32 %v238_v33, %v236_v35  ;;  %v242_v42 = vadd.f32 %v238_v33, %v237_v36  ;;  %404 = vmatpush.msrb.mxu0 %v377_v48 }
  0xc1   :  { %824 = vmatpush.msra.mxu1 %v377_v48  ;;  %v265_v33 = vand.u32 15, %v908_v18 }
  0xc2   :  { %v244_v4 = vmax.f32 %v240_v39, 0.0  ;;  %v989_v3 = vmax.f32 %v239_v40, 0.0  ;;  %v245_v15 = vmax.f32 %v241_v41, 0.0  ;;  %v991_v43 = vmax.f32 %v242_v42, 0.0  ;;  %405 = vmatpush.msrb.mxu0 %v376_v52 }
  0xc3   :  { %825 = vmatpush.msra.mxu1 %v376_v52  ;;  %vm297_vm3 = vcmp.eq.s32.totalorder %v265_v33, 0  ;;  %v686_v39 = vand.u32 7, %v867_v2  ;;  %v489_v40 = vadd.s32 120, %v865_v1  ;;  %v488_v42 = vadd.s32 112, %v865_v1 }
  0xc4   :  { %351 = vrot.lane.b32.xlu0 %v244_v4, %s844_s18  ;;  %349 = vrot.lane.b32.xlu1 %v989_v3, %s844_s18  ;;  %v299_v44 = vrot.slane %v989_v3, 7  ;;  %v324_v45 = vrot.slane %v989_v3, 1  ;;  %v325_v46 = vrot.slane %v244_v4, 1  ;;  %v302_v47 = vrot.slane %v991_v43, 7 }
  0xc5   :  { %v300_v49 = vrot.slane %v244_v4, 7  ;;  %v301_v50 = vrot.slane %v245_v15, 7  ;;  %v326_v55 = vrot.slane %v245_v15, 1  ;;  %406 = vmatpush.msrb.mxu0 %v375_v56  ;;  %826 = vmatpush.msra.mxu1 %v375_v56  ;;  %v327_v6 = vrot.slane %v991_v43, 1 }
  0xc6   :  { %v331_v51 = vsel %vm328_vm13, %v324_v45, %v325_v46  ;;  %v1014_v53 = vsel %vm303_vm14, %v302_v47, %v299_v44  ;;  %v599_v41 = vand.u32 7, %v489_v40  ;;  %v592_v4 = vand.u32 7, %v488_v42 }
  0xc7   :  { %801 = vmatmul.msk.f32.vlgmr.msra.gmra.mxu2 %vm18_vm0, %v331_v51  ;;  %v306_v57 = vsel %vm303_vm14, %v299_v44, %v300_v49  ;;  %v1025_v58 = vsel %vm303_vm14, %v300_v49, %v301_v50  ;;  %v1029_v59 = vsel %vm303_vm14, %v301_v50, %v302_v47  ;;  %v330_v61 = vsel %vm328_vm13, %v325_v46, %v326_v55 }
  0xc8   :  { %407 = vmatpush.msrb.mxu0 %v374_v60  ;;  %v342_v63 = vsel %vm321_vm15, 0.0, %v330_v61  ;;  %827 = vmatpush.msra.mxu1 %v374_v60  ;;  %v329_v14 = vsel %vm328_vm13, %v326_v55, %v327_v6  ;;  %v332_v20 = vsel %vm328_vm13, %v327_v6, %v324_v45  ;;  %v316_v30 = vsel %vm295_vm2, 0.0, %v1014_v53 }
  0xc9   :  { %v344_v24 = vsel %vm323_vm1, 0.0, %v332_v20  ;;  %v318_v35 = vsel %vm297_vm3, 0.0, %v1025_v58  ;;  %vm709_vm4 = vcmp.eq.s32.totalorder %v599_v41, %v686_v39  ;;  %v487_v3 = vadd.s32 104, %v865_v1 }
  0xca   :  { %408 = vmatpush.msrb.mxu0 %v373_v62  ;;  %828 = vmatpush.msra.mxu1 %v373_v62  ;;  %vm708_vm5 = vcmp.eq.s32.totalorder %v592_v4, %v686_v39  ;;  %v485_v2 = vadd.s32 88, %v865_v1  ;;  %v484_v45 = vadd.s32 80, %v865_v1  ;;  %v483_v47 = vadd.s32 72, %v865_v1 }
  0xcb   :  { %805 = vmatpush.msk.msra.mxu3 %vm709_vm4, %v843_v23  ;;  %v482_v49 = vadd.s32 64, %v865_v1  ;;  %v543_v52 = vand.u32 7, %v884_v7  ;;  %v536_v53 = vand.u32 7, %v888_v9  ;;  %v522_v55 = vand.u32 7, %v894_v11 }
  0xcc   :  { %353 = vrot.lane.b32.xlu0 %v245_v15, %s844_s18  ;;  %355 = vrot.lane.b32.xlu1 %v991_v43, %s844_s18  ;;  %v585_v15 = vand.u32 7, %v487_v3  ;;  %v486_v43 = vadd.s32 96, %v865_v1  ;;  %v571_v44 = vand.u32 7, %v485_v2  ;;  %v564_v46 = vand.u32 7, %v484_v45  ;;  %v767_v45 = vld [vmem:[%s1138_s2 + $0x3] sm:$0x1] }
  0xcd   :  { %409 = vmatpush.msrb.mxu0 %v372_v0  ;;  %829 = vmatpush.msra.mxu1 %v372_v0  ;;  %v557_v48 = vand.u32 7, %v483_v47  ;;  %v550_v51 = vand.u32 7, %v482_v49  ;;  %vm701_vm12 = vcmp.eq.s32.totalorder %v543_v52, %v686_v39  ;;  %vm700_vm13 = vcmp.eq.s32.totalorder %v536_v53, %v686_v39 }
  0xce   :  { %806 = vmatpush.msk.msra.mxu3 %vm708_vm5, %v843_v23  ;;  %v578_v22 = vand.u32 7, %v486_v43  ;;  %vm705_vm7 = vcmp.eq.s32.totalorder %v571_v44, %v686_v39  ;;  %vm704_vm8 = vcmp.eq.s32.totalorder %v564_v46, %v686_v39  ;;  %vm699_vm14 = vcmp.eq.s32.totalorder %v529_v54, %v686_v39  ;;  %v751_v43 = vld [vmem:[%s1138_s2 + $0x2] sm:$0x1] }
  0xcf   :  { %802 = vmatmul.msk.f32.gmra.mxu2 %vm18_vm0, %v342_v63  ;;  %410 = vmatpush.msrb.mxu0 %v371_v5  ;;  %vm703_vm10 = vcmp.eq.s32.totalorder %v557_v48, %v686_v39  ;;  %vm702_vm11 = vcmp.eq.s32.totalorder %v550_v51, %v686_v39  ;;  %v515_v56 = vand.u32 7, %v897_v12  ;;  %vm698_vm15 = vcmp.eq.s32.totalorder %v522_v55, %v686_v39 }
  0xd0   :  { %830 = vmatpush.msra.mxu1 %v371_v5  ;;  %vm706_vm6 = vcmp.eq.s32.totalorder %v578_v22, %v686_v39  ;;  %v508_v7 = vand.u32 7, %v908_v18  ;;  %v501_v9 = vand.u32 7, %v923_v25  ;;  %vm694_vm4 = vcmp.eq.s32.totalorder %v494_v10, %v686_v39 }
  0xd1   :  { %411 = vmatpush.msrb.mxu0 %v370_v8  ;;  %vm697_vm1 = vcmp.eq.s32.totalorder %v515_v56, %v686_v39 }
  0xd2   :  { %831 = vmatpush.msra.mxu1 %v370_v8  ;;  %vm696_vm2 = vcmp.eq.s32.totalorder %v508_v7, %v686_v39  ;;  %vm695_vm3 = vcmp.eq.s32.totalorder %v501_v9, %v686_v39 }
  0xd3   :  { %412 = vmatpush.msrb.mxu0 %v369_v13 }
  0xd4   :  { %832 = vmatpush.msra.mxu1 %v369_v13 }
  0xd5   :  { %413 = vmatpush.msrb.mxu0 %v368_v17 }
  0xd6   :  { %833 = vmatpush.msra.mxu1 %v368_v17 }
  0xd7   :  { %803 = vmatmul.msk.f32.gmra.mxu2 %vm18_vm0, %v329_v14  ;;  %414 = vmatpush.msrb.mxu0 %v367_v19 }
  0xd8   :  { %834 = vmatpush.msra.mxu1 %v367_v19 }
  0xd9   :  { %415 = vmatpush.msrb.mxu0 %v366_v21 }
  0xda   :  { %835 = vmatpush.msra.mxu1 %v366_v21 }
  0xdb   :  { %416 = vmatpush.msrb.mxu0 %v365_v26 }
  0xdc   :  { %836 = vmatpush.msra.mxu1 %v365_v26 }
  0xdf   :  { %804 = vmatmul.msk.f32.gmra.mxu2 %vm18_vm0, %v344_v24 }
 0x136   :  { %v352_v28 = vpop.permute.xlu0 %351  ;;  %v350_v29 = vpop.permute.xlu1 %349 }
 0x137   :  { %v361_v31 = vsel %vm18_vm0, %v316_v30, %v350_v29  ;;  %v362_v32 = vsel %vm18_vm0, %v306_v57, %v352_v28 }
 0x138   :  { %417 = vmatmul.f32.vlgmr.msrb.gmra.mxu0 %v361_v31  ;;  %420 = vmatmul.f32.vlgmr.msra.gmra.mxu1 %v362_v32 }
 0x13e   :  { %v354_v34 = vpop.permute.xlu0 %353  ;;  %v356_v37 = vpop.permute.xlu1 %355 }
 0x13f   :  { %v363_v36 = vsel %vm18_vm0, %v318_v35, %v354_v34  ;;  %v364_v38 = vsel %vm18_vm0, %v1029_v59, %v356_v37  ;;  %vm707_vm0 = vcmp.eq.s32.totalorder %v585_v15, %v686_v39 }
 0x140   :  { %423 = vmatmul.f32.gmra.mxu1 %v363_v36  ;;  %807 = vmatpush.msk.msra.mxu3 %vm707_vm0, %v843_v23 }
 0x142   :  { %808 = vmatpush.msk.msra.mxu3 %vm706_vm6, %v843_v23 }
 0x144   :  { %809 = vmatpush.msk.msra.mxu3 %vm705_vm7, %v843_v23 }
 0x146   :  { %810 = vmatpush.msk.msra.mxu3 %vm704_vm8, %v843_v23 }
 0x148   :  { %426 = vmatmul.f32.gmra.mxu1 %v364_v38  ;;  %811 = vmatpush.msk.msra.mxu3 %vm703_vm10, %v843_v23 }
 0x14a   :  { %v447_v50 = vpop.f32.mrf.mxu2  ;;  %812 = vmatpush.msk.msra.mxu3 %vm702_vm11, %v843_v23 }
 0x14c   :  { %813 = vmatpush.msk.msra.mxu3 %vm701_vm12, %v843_v23 }
 0x14e   :  { %814 = vmatpush.msk.msra.mxu3 %vm700_vm13, %v843_v23 }
 0x150   :  { %815 = vmatpush.msk.msra.mxu3 %vm699_vm14, %v843_v23 }
 0x152   :  { %v450_v57 = vpop.f32.mrf.mxu2  ;;  %816 = vmatpush.msk.msra.mxu3 %vm698_vm15, %v843_v23 }
 0x154   :  { %817 = vmatpush.msk.msra.mxu3 %vm697_vm1, %v843_v23 }
 0x156   :  { %818 = vmatpush.msk.msra.mxu3 %vm696_vm2, %v843_v23 }
 0x158   :  { %819 = vmatpush.msk.msra.mxu3 %vm695_vm3, %v843_v23 }
 0x15a   :  { %v453_v12 = vpop.f32.mrf.mxu2  ;;  %820 = vmatpush.msk.msra.mxu3 %vm694_vm4, %v843_v23 }
 0x162   :  { %v456_v0 = vpop.f32.mrf.mxu2 }
 0x1b5   :  { %v421_v11 = vpop.f32.mrf.mxu1  ;;  %v418_v18 = vpop.f32.mrf.mxu0 }
 0x1b6   :  { %v448_v25 = vadd.f32 %v447_v50, %v418_v18  ;;  %v451_v59 = vadd.f32 %v450_v57, %v421_v11 }
 0x1b8   :  { %v468_v61 = vmul.f32 %v448_v25, %v448_v25  ;;  %v469_v62 = vmul.f32 %v451_v59, %v451_v59  ;;  %v459_v1 = vadd.f32 %v451_v59, %v448_v25 }
 0x1ba   :  { %v472_v6 = vadd.f32 %v469_v62, %v468_v61 }
 0x1bd   :  { %v424_v58 = vpop.f32.mrf.mxu1 }
 0x1be   :  { %v454_v60 = vadd.f32 %v453_v12, %v424_v58 }
 0x1c0   :  { %v470_v63 = vmul.f32 %v454_v60, %v454_v60  ;;  %v460_v8 = vadd.f32 %v459_v1, %v454_v60 }
 0x1c2   :  { %v473_v14 = vadd.f32 %v472_v6, %v470_v63 }
 0x1c5   :  { %v427_v5 = vpop.f32.mrf.mxu1 }
 0x1c6   :  { %v457_v13 = vadd.f32 %v456_v0, %v427_v5 }
 0x1c8   :  { %v461_v16 = vadd.f32 %v460_v8, %v457_v13  ;;  %v471_v17 = vmul.f32 %v457_v13, %v457_v13 }
 0x1ca   :  { %v462_v19 = vrot.slane %v461_v16, 4  ;;  %v474_v20 = vadd.f32 %v473_v14, %v471_v17 }
 0x1cc   :  { %v463_v21 = vadd.f32 %v462_v19, %v461_v16  ;;  %v475_v23 = vrot.slane %v474_v20, 4 }
 0x1ce   :  { %v464_v24 = vrot.slane %v463_v21, 2  ;;  %v476_v26 = vadd.f32 %v475_v23, %v474_v20 }
 0x1d0   :  { %v465_v27 = vadd.f32 %v464_v24, %v463_v21  ;;  %v477_v28 = vrot.slane %v476_v26, 2 }
 0x1d2   :  { %v466_v29 = vrot.slane %v465_v27, 1  ;;  %v478_v30 = vadd.f32 %v477_v28, %v476_v26 }
 0x1d4   :  { %v479_v31 = vrot.slane %v478_v30, 1  ;;  %v467_v32 = vadd.f32 %v466_v29, %v465_v27 }
 0x1d6   :  { %v480_v33 = vadd.f32 %v479_v31, %v478_v30 }
 0x1d8   :  { %v481_v34 = vsel %vm49_vm9, %v467_v32, %v480_v33 }
 0x1d9   :  { %742 = vmatmul.f32.vlgmr.msra.gmra.mxu3 %v481_v34 }
 0x25c   :  { %v743_v35 = vpop.f32.mrf.mxu3 }
 0x25d   :  { %v746_v36 = vmul.f32 %v743_v35, %v743_v35 }
 0x25f   :  { %v748_v37 = vrot.slane %v746_v36, 7 }
 0x261   :  { %v750_v38 = vsub.f32 %v743_v35, %v748_v37 }
 0x263   :  { %v752_v39 = vadd.f32 1e-05, %v750_v38 }
 0x265   :  { %841 = vrsqrt.f32 %v752_v39  ;;  %vm759_vm0 = vweird.f32 %v752_v39 }
 0x26b   :  { %v842_v40 = vpop.eup %841 }
 0x26c   :  { %v754_v41 = vmul.f32 %v842_v40, %v752_v39  ;;  %vm760_vm5 = vweird.f32 %v842_v40 }
 0x26d   :  { %vm761_vm6 = vmor %vm759_vm0, %vm760_vm5 }
 0x26e   :  { %v755_v42 = vmul.f32 %v842_v40, %v754_v41 }
 0x270   :  { %v756_v4 = vmul.f32 0.5, %v755_v42 }
 0x272   :  { %v757_v3 = vsub.f32 1.5, %v756_v4 }
 0x274   :  { %v758_v15 = vmul.f32 %v842_v40, %v757_v3 }
 0x276   :  { %v762_v22 = vsel %vm761_vm6, %v842_v40, %v758_v15 }
 0x277   :  { %v764_v2 = vrot.slane %v762_v22, 1 }
 0x279   :  { %v766_v44 = vmul.f32 %v764_v2, %v751_v43 }
 0x27b   :  { %v768_v46 = vmul.f32 %v766_v44, %v743_v35  ;;  %v770_v47 = vperm.slane %v766_v44, 0 }
 0x27d   :  { %v769_v48 = vsub.f32 %v767_v45, %v768_v46  ;;  %v771_v49 = vmul.f32 %v770_v47, %v448_v25  ;;  %v772_v50 = vmul.f32 %v770_v47, %v451_v59  ;;  %v773_v51 = vmul.f32 %v770_v47, %v454_v60 }
 0x27e   :  { %v774_v52 = vmul.f32 %v770_v47, %v457_v13 }
 0x27f   :  { %v775_v53 = vperm.slane %v769_v48, 0 }
 0x281   :  { %v776_v54 = vadd.f32 %v775_v53, %v771_v49  ;;  %v777_v55 = vadd.f32 %v775_v53, %v772_v50  ;;  %v778_v56 = vadd.f32 %v775_v53, %v773_v51  ;;  %v779_v7 = vadd.f32 %v775_v53, %v774_v52 }
 0x283   :  { %v780_v57 = vmax.f32 %v776_v54, 0.0  ;;  %v781_v9 = vmax.f32 %v777_v55, 0.0  ;;  %v782_v10 = vmax.f32 %v778_v56, 0.0  ;;  %v783_v11 = vmax.f32 %v779_v7, 0.0 }
 0x285   :  { %784 = vst [vmem:[%s1139_s3] sm:$0xff] %v780_v57 }
 0x286   :  { %785 = vst [vmem:[%s1139_s3 + $0x8] sm:$0xff] %v781_v9 }
 0x287   :  { %786 = vst [vmem:[%s1139_s3 + $0x10] sm:$0xff] %v782_v10 }
 0x288   :  { %787 = vst [vmem:[%s1139_s3 + $0x18] sm:$0xff] %v783_v11 }

</bundles_post_ra>
